<compile_context>
chip_gen: v6e
topology: v6e:2x2x1
jax: 0.10.0
libtpu: 0.0.40
codegen_flags: <defaults>
</compile_context>

<pallas_src>
import jax
import jax.numpy as jnp
from jax.experimental import pallas as pl
from jax.experimental.pallas import tpu as pltpu


DEFAULT_ROWS_PER_STEP = 64  # tokens gathered per grid step (sweep 32/64/128)


def _make_gather_kernel(rows_per_step: int):
    """Build a kernel that gathers `rows_per_step` table rows per grid step."""

    def kernel(ids_ref, table_hbm, out_ref, sem):
        # ids_ref   : (n_pad,) int32 in SMEM (scalar prefetch)
        # table_hbm : (V, D) raw HBM ref (memory_space=pl.ANY)
        # out_ref   : (rows_per_step, D) VMEM output tile (auto written back)
        # sem       : (rows_per_step,) DMA semaphores
        base = pl.program_id(0) * rows_per_step
        copies = []
        # Issue all row-gather DMAs first (concurrent, latency-hiding), then wait.
        for j in range(rows_per_step):           # static unroll
            row = ids_ref[base + j]
            cp = pltpu.make_async_copy(
                table_hbm.at[pl.ds(row, 1), :],   # (1, D) source row in HBM
                out_ref.at[pl.ds(j, 1), :],       # (1, D) slot in the output tile
                sem.at[j],
            )
            cp.start()
            copies.append(cp)
        for cp in copies:
            cp.wait()

    return kernel


def _pick_rows_per_step(n: int, requested: int):
    """Choose a sublane-aligned rows_per_step; avoid output padding when possible."""
    rps = max(8, (requested // 8) * 8)
    if n % rps == 0:
        return rps, n
    # Try to shrink to a multiple of 8 that divides n exactly (no padding / no slice).
    r = rps - 8
    while r >= 8:
        if n % r == 0:
            return r, n
        r -= 8
    # Ragged: pad ids to a multiple of rps and slice the tail off afterwards.
    n_pad = rps * ((n + rps - 1) // rps)
    return rps, n_pad


def lookup_embedding(input_ids: jax.Array, table: jax.Array,
                     *, rows_per_step: int = DEFAULT_ROWS_PER_STEP) -> jax.Array:
    """input_ids: (B, S) int; table: (V, D) -> (B, S, D), like nn.Embedding."""
    b, s = input_ids.shape
    v, d = table.shape
    n = b * s

    rps, n_pad = _pick_rows_per_step(n, rows_per_step)

    # TODO(synk): torch.nn.Embedding raises on out-of-range ids; we clamp instead
    # (no in-kernel exception path on TPU).  Clamping also makes the pad ids safe.
    ids_flat = jnp.clip(input_ids.reshape(n).astype(jnp.int32), 0, v - 1)
    if n_pad != n:
        ids_flat = jnp.concatenate(
            [ids_flat, jnp.zeros((n_pad - n,), dtype=jnp.int32)])

    itemsize = jnp.dtype(table.dtype).itemsize
    cost = pl.CostEstimate(
        flops=0,
        transcendentals=0,
        bytes_accessed=2 * n_pad * d * itemsize + n_pad * 4,
    )

    out_flat = pl.pallas_call(
        _make_gather_kernel(rps),
        out_shape=jax.ShapeDtypeStruct((n_pad, d), table.dtype),
        grid_spec=pltpu.PrefetchScalarGridSpec(
            num_scalar_prefetch=1,
            grid=(n_pad // rps,),
            in_specs=[pl.BlockSpec(memory_space=pl.ANY)],   # table stays in HBM
            out_specs=pl.BlockSpec((rps, d), lambda i, ids: (i, 0)),
            scratch_shapes=[pltpu.SemaphoreType.DMA((rps,))],
        ),
        compiler_params=pltpu.CompilerParams(
            dimension_semantics=("parallel",),   # v7x: 2 TCs split the token loop
        ),
        cost_estimate=cost,
    )(ids_flat, table)

    if n_pad != n:
        out_flat = out_flat[:n]
    return out_flat.reshape(b, s, d)


if __name__ == "__main__":
    # Module hyperparameters (small, consistent with the forward pass).
    vocab_size = 64
    embedding_dim = 32
    padding_idx = 0
    batch, seq_len = 2, 8

    key = jax.random.PRNGKey(0)
    k_table, k_ids = jax.random.split(key)

    # nn.Embedding default init: N(0, 1); the padding_idx row is zeroed.
    table = jax.random.normal(k_table, (vocab_size, embedding_dim),
                              dtype=jnp.float32)
    table = table.at[padding_idx].set(0.0)

    # Deterministic token ids, including some padding (0) tokens.
    input_ids = jax.random.randint(k_ids, (batch, seq_len), 0, vocab_size,
                                   dtype=jnp.int32)
    input_ids = input_ids.at[:, -1].set(padding_idx)

    out = lookup_embedding(input_ids, table)
    out = jax.block_until_ready(out)

    # Sanity check against plain-JAX reference gather.
    ref = table[input_ids]
    assert out.shape == (batch, seq_len, embedding_dim)
    assert jnp.allclose(out, ref, atol=1e-6), "mismatch vs reference gather"
    assert jnp.allclose(out[:, -1, :], 0.0), "padding row should be zero"

    print("KERNEL_OK")
</pallas_src>

<mosaic_0001>
module attributes {stable_mosaic.version = 11 : i64} {
  func.func @kernel(%arg0: i32, %arg1: memref<16xi32, #tpu.memory_space<smem>>, %arg2: memref<64x32xf32, #tpu.memory_space<any>>, %arg3: memref<16x32xf32, #tpu.memory_space<vmem>>, %arg4: memref<16x!tpu.dma_semaphore, #tpu.memory_space<semaphore_mem>>) attributes {dimension_semantics = [#tpu.dimension_semantics<parallel>], iteration_bounds = array<i64: 1>, scalar_prefetch = 1 : i64, scratch_operands = 1 : i64, tpu.core_type = #tpu.core_type<tc>, window_params = [{}, {transform_indices = @transform_1, window_bounds = array<i64: 16, 32>}]} {
    %c16_i32 = arith.constant 16 : i32
    %0 = arith.muli %arg0, %c16_i32 : i32
    %c0_i32 = arith.constant 0 : i32
    %1 = arith.addi %0, %c0_i32 : i32
    %2 = arith.index_cast %1 : i32 to index
    %3 = memref.load %arg1[%2] : memref<16xi32, #tpu.memory_space<smem>>
    %c0_i32_0 = arith.constant 0 : i32
    %c0_i32_1 = arith.constant 0 : i32
    %4 = tpu.memref_slice %arg2[%3, %c0_i32_1] : memref<64x32xf32, #tpu.memory_space<any>> -> memref<1x32xf32, #tpu.memory_space<any>>
    %c0_i32_2 = arith.constant 0 : i32
    %c0_i32_3 = arith.constant 0 : i32
    %5 = tpu.memref_slice %arg3[%c0_i32_2, %c0_i32_3] : memref<16x32xf32, #tpu.memory_space<vmem>> -> memref<1x32xf32, #tpu.memory_space<vmem>>
    %6 = tpu.memref_slice %arg4[%c0_i32_0] : memref<16x!tpu.dma_semaphore, #tpu.memory_space<semaphore_mem>> -> memref<1x!tpu.dma_semaphore, #tpu.memory_space<semaphore_mem>>
    %7 = tpu.memref_squeeze %6 : memref<1x!tpu.dma_semaphore, #tpu.memory_space<semaphore_mem>> -> memref<!tpu.dma_semaphore, #tpu.memory_space<semaphore_mem>>
    tpu.enqueue_dma source(%4 : memref<1x32xf32, #tpu.memory_space<any>>) target(%5 : memref<1x32xf32, #tpu.memory_space<vmem>>) target_semaphore(%7 : memref<!tpu.dma_semaphore, #tpu.memory_space<semaphore_mem>>)
    %c1_i32 = arith.constant 1 : i32
    %8 = arith.addi %0, %c1_i32 : i32
    %9 = arith.index_cast %8 : i32 to index
    %10 = memref.load %arg1[%9] : memref<16xi32, #tpu.memory_space<smem>>
    %c1_i32_4 = arith.constant 1 : i32
    %c0_i32_5 = arith.constant 0 : i32
    %11 = tpu.memref_slice %arg2[%10, %c0_i32_5] : memref<64x32xf32, #tpu.memory_space<any>> -> memref<1x32xf32, #tpu.memory_space<any>>
    %c1_i32_6 = arith.constant 1 : i32
    %c0_i32_7 = arith.constant 0 : i32
    %12 = tpu.memref_slice %arg3[%c1_i32_6, %c0_i32_7] : memref<16x32xf32, #tpu.memory_space<vmem>> -> memref<1x32xf32, #tpu.memory_space<vmem>>
    %13 = tpu.memref_slice %arg4[%c1_i32_4] : memref<16x!tpu.dma_semaphore, #tpu.memory_space<semaphore_mem>> -> memref<1x!tpu.dma_semaphore, #tpu.memory_space<semaphore_mem>>
    %14 = tpu.memref_squeeze %13 : memref<1x!tpu.dma_semaphore, #tpu.memory_space<semaphore_mem>> -> memref<!tpu.dma_semaphore, #tpu.memory_space<semaphore_mem>>
    tpu.enqueue_dma source(%11 : memref<1x32xf32, #tpu.memory_space<any>>) target(%12 : memref<1x32xf32, #tpu.memory_space<vmem>>) target_semaphore(%14 : memref<!tpu.dma_semaphore, #tpu.memory_space<semaphore_mem>>)
    %c2_i32 = arith.constant 2 : i32
    %15 = arith.addi %0, %c2_i32 : i32
    %16 = arith.index_cast %15 : i32 to index
    %17 = memref.load %arg1[%16] : memref<16xi32, #tpu.memory_space<smem>>
    %c2_i32_8 = arith.constant 2 : i32
    %c0_i32_9 = arith.constant 0 : i32
    %18 = tpu.memref_slice %arg2[%17, %c0_i32_9] : memref<64x32xf32, #tpu.memory_space<any>> -> memref<1x32xf32, #tpu.memory_space<any>>
    %c2_i32_10 = arith.constant 2 : i32
    %c0_i32_11 = arith.constant 0 : i32
    %19 = tpu.memref_slice %arg3[%c2_i32_10, %c0_i32_11] : memref<16x32xf32, #tpu.memory_space<vmem>> -> memref<1x32xf32, #tpu.memory_space<vmem>>
    %20 = tpu.memref_slice %arg4[%c2_i32_8] : memref<16x!tpu.dma_semaphore, #tpu.memory_space<semaphore_mem>> -> memref<1x!tpu.dma_semaphore, #tpu.memory_space<semaphore_mem>>
    %21 = tpu.memref_squeeze %20 : memref<1x!tpu.dma_semaphore, #tpu.memory_space<semaphore_mem>> -> memref<!tpu.dma_semaphore, #tpu.memory_space<semaphore_mem>>
    tpu.enqueue_dma source(%18 : memref<1x32xf32, #tpu.memory_space<any>>) target(%19 : memref<1x32xf32, #tpu.memory_space<vmem>>) target_semaphore(%21 : memref<!tpu.dma_semaphore, #tpu.memory_space<semaphore_mem>>)
    %c3_i32 = arith.constant 3 : i32
    %22 = arith.addi %0, %c3_i32 : i32
    %23 = arith.index_cast %22 : i32 to index
    %24 = memref.load %arg1[%23] : memref<16xi32, #tpu.memory_space<smem>>
    %c3_i32_12 = arith.constant 3 : i32
    %c0_i32_13 = arith.constant 0 : i32
    %25 = tpu.memref_slice %arg2[%24, %c0_i32_13] : memref<64x32xf32, #tpu.memory_space<any>> -> memref<1x32xf32, #tpu.memory_space<any>>
    %c3_i32_14 = arith.constant 3 : i32
    %c0_i32_15 = arith.constant 0 : i32
    %26 = tpu.memref_slice %arg3[%c3_i32_14, %c0_i32_15] : memref<16x32xf32, #tpu.memory_space<vmem>> -> memref<1x32xf32, #tpu.memory_space<vmem>>
    %27 = tpu.memref_slice %arg4[%c3_i32_12] : memref<16x!tpu.dma_semaphore, #tpu.memory_space<semaphore_mem>> -> memref<1x!tpu.dma_semaphore, #tpu.memory_space<semaphore_mem>>
    %28 = tpu.memref_squeeze %27 : memref<1x!tpu.dma_semaphore, #tpu.memory_space<semaphore_mem>> -> memref<!tpu.dma_semaphore, #tpu.memory_space<semaphore_mem>>
    tpu.enqueue_dma source(%25 : memref<1x32xf32, #tpu.memory_space<any>>) target(%26 : memref<1x32xf32, #tpu.memory_space<vmem>>) target_semaphore(%28 : memref<!tpu.dma_semaphore, #tpu.memory_space<semaphore_mem>>)
    %c4_i32 = arith.constant 4 : i32
    %29 = arith.addi %0, %c4_i32 : i32
    %30 = arith.index_cast %29 : i32 to index
    %31 = memref.load %arg1[%30] : memref<16xi32, #tpu.memory_space<smem>>
    %c4_i32_16 = arith.constant 4 : i32
    %c0_i32_17 = arith.constant 0 : i32
    %32 = tpu.memref_slice %arg2[%31, %c0_i32_17] : memref<64x32xf32, #tpu.memory_space<any>> -> memref<1x32xf32, #tpu.memory_space<any>>
    %c4_i32_18 = arith.constant 4 : i32
    %c0_i32_19 = arith.constant 0 : i32
    %33 = tpu.memref_slice %arg3[%c4_i32_18, %c0_i32_19] : memref<16x32xf32, #tpu.memory_space<vmem>> -> memref<1x32xf32, #tpu.memory_space<vmem>>
    %34 = tpu.memref_slice %arg4[%c4_i32_16] : memref<16x!tpu.dma_semaphore, #tpu.memory_space<semaphore_mem>> -> memref<1x!tpu.dma_semaphore, #tpu.memory_space<semaphore_mem>>
    %35 = tpu.memref_squeeze %34 : memref<1x!tpu.dma_semaphore, #tpu.memory_space<semaphore_mem>> -> memref<!tpu.dma_semaphore, #tpu.memory_space<semaphore_mem>>
    tpu.enqueue_dma source(%32 : memref<1x32xf32, #tpu.memory_space<any>>) target(%33 : memref<1x32xf32, #tpu.memory_space<vmem>>) target_semaphore(%35 : memref<!tpu.dma_semaphore, #tpu.memory_space<semaphore_mem>>)
    %c5_i32 = arith.constant 5 : i32
    %36 = arith.addi %0, %c5_i32 : i32
    %37 = arith.index_cast %36 : i32 to index
    %38 = memref.load %arg1[%37] : memref<16xi32, #tpu.memory_space<smem>>
    %c5_i32_20 = arith.constant 5 : i32
    %c0_i32_21 = arith.constant 0 : i32
    %39 = tpu.memref_slice %arg2[%38, %c0_i32_21] : memref<64x32xf32, #tpu.memory_space<any>> -> memref<1x32xf32, #tpu.memory_space<any>>
    %c5_i32_22 = arith.constant 5 : i32
    %c0_i32_23 = arith.constant 0 : i32
    %40 = tpu.memref_slice %arg3[%c5_i32_22, %c0_i32_23] : memref<16x32xf32, #tpu.memory_space<vmem>> -> memref<1x32xf32, #tpu.memory_space<vmem>>
    %41 = tpu.memref_slice %arg4[%c5_i32_20] : memref<16x!tpu.dma_semaphore, #tpu.memory_space<semaphore_mem>> -> memref<1x!tpu.dma_semaphore, #tpu.memory_space<semaphore_mem>>
    %42 = tpu.memref_squeeze %41 : memref<1x!tpu.dma_semaphore, #tpu.memory_space<semaphore_mem>> -> memref<!tpu.dma_semaphore, #tpu.memory_space<semaphore_mem>>
    tpu.enqueue_dma source(%39 : memref<1x32xf32, #tpu.memory_space<any>>) target(%40 : memref<1x32xf32, #tpu.memory_space<vmem>>) target_semaphore(%42 : memref<!tpu.dma_semaphore, #tpu.memory_space<semaphore_mem>>)
    %c6_i32 = arith.constant 6 : i32
    %43 = arith.addi %0, %c6_i32 : i32
    %44 = arith.index_cast %43 : i32 to index
    %45 = memref.load %arg1[%44] : memref<16xi32, #tpu.memory_space<smem>>
    %c6_i32_24 = arith.constant 6 : i32
    %c0_i32_25 = arith.constant 0 : i32
    %46 = tpu.memref_slice %arg2[%45, %c0_i32_25] : memref<64x32xf32, #tpu.memory_space<any>> -> memref<1x32xf32, #tpu.memory_space<any>>
    %c6_i32_26 = arith.constant 6 : i32
    %c0_i32_27 = arith.constant 0 : i32
    %47 = tpu.memref_slice %arg3[%c6_i32_26, %c0_i32_27] : memref<16x32xf32, #tpu.memory_space<vmem>> -> memref<1x32xf32, #tpu.memory_space<vmem>>
    %48 = tpu.memref_slice %arg4[%c6_i32_24] : memref<16x!tpu.dma_semaphore, #tpu.memory_space<semaphore_mem>> -> memref<1x!tpu.dma_semaphore, #tpu.memory_space<semaphore_mem>>
    %49 = tpu.memref_squeeze %48 : memref<1x!tpu.dma_semaphore, #tpu.memory_space<semaphore_mem>> -> memref<!tpu.dma_semaphore, #tpu.memory_space<semaphore_mem>>
    tpu.enqueue_dma source(%46 : memref<1x32xf32, #tpu.memory_space<any>>) target(%47 : memref<1x32xf32, #tpu.memory_space<vmem>>) target_semaphore(%49 : memref<!tpu.dma_semaphore, #tpu.memory_space<semaphore_mem>>)
    %c7_i32 = arith.constant 7 : i32
    %50 = arith.addi %0, %c7_i32 : i32
    %51 = arith.index_cast %50 : i32 to index
    %52 = memref.load %arg1[%51] : memref<16xi32, #tpu.memory_space<smem>>
    %c7_i32_28 = arith.constant 7 : i32
    %c0_i32_29 = arith.constant 0 : i32
    %53 = tpu.memref_slice %arg2[%52, %c0_i32_29] : memref<64x32xf32, #tpu.memory_space<any>> -> memref<1x32xf32, #tpu.memory_space<any>>
    %c7_i32_30 = arith.constant 7 : i32
    %c0_i32_31 = arith.constant 0 : i32
    %54 = tpu.memref_slice %arg3[%c7_i32_30, %c0_i32_31] : memref<16x32xf32, #tpu.memory_space<vmem>> -> memref<1x32xf32, #tpu.memory_space<vmem>>
    %55 = tpu.memref_slice %arg4[%c7_i32_28] : memref<16x!tpu.dma_semaphore, #tpu.memory_space<semaphore_mem>> -> memref<1x!tpu.dma_semaphore, #tpu.memory_space<semaphore_mem>>
    %56 = tpu.memref_squeeze %55 : memref<1x!tpu.dma_semaphore, #tpu.memory_space<semaphore_mem>> -> memref<!tpu.dma_semaphore, #tpu.memory_space<semaphore_mem>>
    tpu.enqueue_dma source(%53 : memref<1x32xf32, #tpu.memory_space<any>>) target(%54 : memref<1x32xf32, #tpu.memory_space<vmem>>) target_semaphore(%56 : memref<!tpu.dma_semaphore, #tpu.memory_space<semaphore_mem>>)
    %c8_i32 = arith.constant 8 : i32
    %57 = arith.addi %0, %c8_i32 : i32
    %58 = arith.index_cast %57 : i32 to index
    %59 = memref.load %arg1[%58] : memref<16xi32, #tpu.memory_space<smem>>
    %c8_i32_32 = arith.constant 8 : i32
    %c0_i32_33 = arith.constant 0 : i32
    %60 = tpu.memref_slice %arg2[%59, %c0_i32_33] : memref<64x32xf32, #tpu.memory_space<any>> -> memref<1x32xf32, #tpu.memory_space<any>>
    %c8_i32_34 = arith.constant 8 : i32
    %c0_i32_35 = arith.constant 0 : i32
    %61 = tpu.memref_slice %arg3[%c8_i32_34, %c0_i32_35] : memref<16x32xf32, #tpu.memory_space<vmem>> -> memref<1x32xf32, #tpu.memory_space<vmem>>
    %62 = tpu.memref_slice %arg4[%c8_i32_32] : memref<16x!tpu.dma_semaphore, #tpu.memory_space<semaphore_mem>> -> memref<1x!tpu.dma_semaphore, #tpu.memory_space<semaphore_mem>>
    %63 = tpu.memref_squeeze %62 : memref<1x!tpu.dma_semaphore, #tpu.memory_space<semaphore_mem>> -> memref<!tpu.dma_semaphore, #tpu.memory_space<semaphore_mem>>
    tpu.enqueue_dma source(%60 : memref<1x32xf32, #tpu.memory_space<any>>) target(%61 : memref<1x32xf32, #tpu.memory_space<vmem>>) target_semaphore(%63 : memref<!tpu.dma_semaphore, #tpu.memory_space<semaphore_mem>>)
    %c9_i32 = arith.constant 9 : i32
    %64 = arith.addi %0, %c9_i32 : i32
    %65 = arith.index_cast %64 : i32 to index
    %66 = memref.load %arg1[%65] : memref<16xi32, #tpu.memory_space<smem>>
    %c9_i32_36 = arith.constant 9 : i32
    %c0_i32_37 = arith.constant 0 : i32
    %67 = tpu.memref_slice %arg2[%66, %c0_i32_37] : memref<64x32xf32, #tpu.memory_space<any>> -> memref<1x32xf32, #tpu.memory_space<any>>
    %c9_i32_38 = arith.constant 9 : i32
    %c0_i32_39 = arith.constant 0 : i32
    %68 = tpu.memref_slice %arg3[%c9_i32_38, %c0_i32_39] : memref<16x32xf32, #tpu.memory_space<vmem>> -> memref<1x32xf32, #tpu.memory_space<vmem>>
    %69 = tpu.memref_slice %arg4[%c9_i32_36] : memref<16x!tpu.dma_semaphore, #tpu.memory_space<semaphore_mem>> -> memref<1x!tpu.dma_semaphore, #tpu.memory_space<semaphore_mem>>
    %70 = tpu.memref_squeeze %69 : memref<1x!tpu.dma_semaphore, #tpu.memory_space<semaphore_mem>> -> memref<!tpu.dma_semaphore, #tpu.memory_space<semaphore_mem>>
    tpu.enqueue_dma source(%67 : memref<1x32xf32, #tpu.memory_space<any>>) target(%68 : memref<1x32xf32, #tpu.memory_space<vmem>>) target_semaphore(%70 : memref<!tpu.dma_semaphore, #tpu.memory_space<semaphore_mem>>)
    %c10_i32 = arith.constant 10 : i32
    %71 = arith.addi %0, %c10_i32 : i32
    %72 = arith.index_cast %71 : i32 to index
    %73 = memref.load %arg1[%72] : memref<16xi32, #tpu.memory_space<smem>>
    %c10_i32_40 = arith.constant 10 : i32
    %c0_i32_41 = arith.constant 0 : i32
    %74 = tpu.memref_slice %arg2[%73, %c0_i32_41] : memref<64x32xf32, #tpu.memory_space<any>> -> memref<1x32xf32, #tpu.memory_space<any>>
    %c10_i32_42 = arith.constant 10 : i32
    %c0_i32_43 = arith.constant 0 : i32
    %75 = tpu.memref_slice %arg3[%c10_i32_42, %c0_i32_43] : memref<16x32xf32, #tpu.memory_space<vmem>> -> memref<1x32xf32, #tpu.memory_space<vmem>>
    %76 = tpu.memref_slice %arg4[%c10_i32_40] : memref<16x!tpu.dma_semaphore, #tpu.memory_space<semaphore_mem>> -> memref<1x!tpu.dma_semaphore, #tpu.memory_space<semaphore_mem>>
    %77 = tpu.memref_squeeze %76 : memref<1x!tpu.dma_semaphore, #tpu.memory_space<semaphore_mem>> -> memref<!tpu.dma_semaphore, #tpu.memory_space<semaphore_mem>>
    tpu.enqueue_dma source(%74 : memref<1x32xf32, #tpu.memory_space<any>>) target(%75 : memref<1x32xf32, #tpu.memory_space<vmem>>) target_semaphore(%77 : memref<!tpu.dma_semaphore, #tpu.memory_space<semaphore_mem>>)
    %c11_i32 = arith.constant 11 : i32
    %78 = arith.addi %0, %c11_i32 : i32
    %79 = arith.index_cast %78 : i32 to index
    %80 = memref.load %arg1[%79] : memref<16xi32, #tpu.memory_space<smem>>
    %c11_i32_44 = arith.constant 11 : i32
    %c0_i32_45 = arith.constant 0 : i32
    %81 = tpu.memref_slice %arg2[%80, %c0_i32_45] : memref<64x32xf32, #tpu.memory_space<any>> -> memref<1x32xf32, #tpu.memory_space<any>>
    %c11_i32_46 = arith.constant 11 : i32
    %c0_i32_47 = arith.constant 0 : i32
    %82 = tpu.memref_slice %arg3[%c11_i32_46, %c0_i32_47] : memref<16x32xf32, #tpu.memory_space<vmem>> -> memref<1x32xf32, #tpu.memory_space<vmem>>
    %83 = tpu.memref_slice %arg4[%c11_i32_44] : memref<16x!tpu.dma_semaphore, #tpu.memory_space<semaphore_mem>> -> memref<1x!tpu.dma_semaphore, #tpu.memory_space<semaphore_mem>>
    %84 = tpu.memref_squeeze %83 : memref<1x!tpu.dma_semaphore, #tpu.memory_space<semaphore_mem>> -> memref<!tpu.dma_semaphore, #tpu.memory_space<semaphore_mem>>
    tpu.enqueue_dma source(%81 : memref<1x32xf32, #tpu.memory_space<any>>) target(%82 : memref<1x32xf32, #tpu.memory_space<vmem>>) target_semaphore(%84 : memref<!tpu.dma_semaphore, #tpu.memory_space<semaphore_mem>>)
    %c12_i32 = arith.constant 12 : i32
    %85 = arith.addi %0, %c12_i32 : i32
    %86 = arith.index_cast %85 : i32 to index
    %87 = memref.load %arg1[%86] : memref<16xi32, #tpu.memory_space<smem>>
    %c12_i32_48 = arith.constant 12 : i32
    %c0_i32_49 = arith.constant 0 : i32
    %88 = tpu.memref_slice %arg2[%87, %c0_i32_49] : memref<64x32xf32, #tpu.memory_space<any>> -> memref<1x32xf32, #tpu.memory_space<any>>
    %c12_i32_50 = arith.constant 12 : i32
    %c0_i32_51 = arith.constant 0 : i32
    %89 = tpu.memref_slice %arg3[%c12_i32_50, %c0_i32_51] : memref<16x32xf32, #tpu.memory_space<vmem>> -> memref<1x32xf32, #tpu.memory_space<vmem>>
    %90 = tpu.memref_slice %arg4[%c12_i32_48] : memref<16x!tpu.dma_semaphore, #tpu.memory_space<semaphore_mem>> -> memref<1x!tpu.dma_semaphore, #tpu.memory_space<semaphore_mem>>
    %91 = tpu.memref_squeeze %90 : memref<1x!tpu.dma_semaphore, #tpu.memory_space<semaphore_mem>> -> memref<!tpu.dma_semaphore, #tpu.memory_space<semaphore_mem>>
    tpu.enqueue_dma source(%88 : memref<1x32xf32, #tpu.memory_space<any>>) target(%89 : memref<1x32xf32, #tpu.memory_space<vmem>>) target_semaphore(%91 : memref<!tpu.dma_semaphore, #tpu.memory_space<semaphore_mem>>)
    %c13_i32 = arith.constant 13 : i32
    %92 = arith.addi %0, %c13_i32 : i32
    %93 = arith.index_cast %92 : i32 to index
    %94 = memref.load %arg1[%93] : memref<16xi32, #tpu.memory_space<smem>>
    %c13_i32_52 = arith.constant 13 : i32
    %c0_i32_53 = arith.constant 0 : i32
    %95 = tpu.memref_slice %arg2[%94, %c0_i32_53] : memref<64x32xf32, #tpu.memory_space<any>> -> memref<1x32xf32, #tpu.memory_space<any>>
    %c13_i32_54 = arith.constant 13 : i32
    %c0_i32_55 = arith.constant 0 : i32
    %96 = tpu.memref_slice %arg3[%c13_i32_54, %c0_i32_55] : memref<16x32xf32, #tpu.memory_space<vmem>> -> memref<1x32xf32, #tpu.memory_space<vmem>>
    %97 = tpu.memref_slice %arg4[%c13_i32_52] : memref<16x!tpu.dma_semaphore, #tpu.memory_space<semaphore_mem>> -> memref<1x!tpu.dma_semaphore, #tpu.memory_space<semaphore_mem>>
    %98 = tpu.memref_squeeze %97 : memref<1x!tpu.dma_semaphore, #tpu.memory_space<semaphore_mem>> -> memref<!tpu.dma_semaphore, #tpu.memory_space<semaphore_mem>>
    tpu.enqueue_dma source(%95 : memref<1x32xf32, #tpu.memory_space<any>>) target(%96 : memref<1x32xf32, #tpu.memory_space<vmem>>) target_semaphore(%98 : memref<!tpu.dma_semaphore, #tpu.memory_space<semaphore_mem>>)
    %c14_i32 = arith.constant 14 : i32
    %99 = arith.addi %0, %c14_i32 : i32
    %100 = arith.index_cast %99 : i32 to index
    %101 = memref.load %arg1[%100] : memref<16xi32, #tpu.memory_space<smem>>
    %c14_i32_56 = arith.constant 14 : i32
    %c0_i32_57 = arith.constant 0 : i32
    %102 = tpu.memref_slice %arg2[%101, %c0_i32_57] : memref<64x32xf32, #tpu.memory_space<any>> -> memref<1x32xf32, #tpu.memory_space<any>>
    %c14_i32_58 = arith.constant 14 : i32
    %c0_i32_59 = arith.constant 0 : i32
    %103 = tpu.memref_slice %arg3[%c14_i32_58, %c0_i32_59] : memref<16x32xf32, #tpu.memory_space<vmem>> -> memref<1x32xf32, #tpu.memory_space<vmem>>
    %104 = tpu.memref_slice %arg4[%c14_i32_56] : memref<16x!tpu.dma_semaphore, #tpu.memory_space<semaphore_mem>> -> memref<1x!tpu.dma_semaphore, #tpu.memory_space<semaphore_mem>>
    %105 = tpu.memref_squeeze %104 : memref<1x!tpu.dma_semaphore, #tpu.memory_space<semaphore_mem>> -> memref<!tpu.dma_semaphore, #tpu.memory_space<semaphore_mem>>
    tpu.enqueue_dma source(%102 : memref<1x32xf32, #tpu.memory_space<any>>) target(%103 : memref<1x32xf32, #tpu.memory_space<vmem>>) target_semaphore(%105 : memref<!tpu.dma_semaphore, #tpu.memory_space<semaphore_mem>>)
    %c15_i32 = arith.constant 15 : i32
    %106 = arith.addi %0, %c15_i32 : i32
    %107 = arith.index_cast %106 : i32 to index
    %108 = memref.load %arg1[%107] : memref<16xi32, #tpu.memory_space<smem>>
    %c15_i32_60 = arith.constant 15 : i32
    %c0_i32_61 = arith.constant 0 : i32
    %109 = tpu.memref_slice %arg2[%108, %c0_i32_61] : memref<64x32xf32, #tpu.memory_space<any>> -> memref<1x32xf32, #tpu.memory_space<any>>
    %c15_i32_62 = arith.constant 15 : i32
    %c0_i32_63 = arith.constant 0 : i32
    %110 = tpu.memref_slice %arg3[%c15_i32_62, %c0_i32_63] : memref<16x32xf32, #tpu.memory_space<vmem>> -> memref<1x32xf32, #tpu.memory_space<vmem>>
    %111 = tpu.memref_slice %arg4[%c15_i32_60] : memref<16x!tpu.dma_semaphore, #tpu.memory_space<semaphore_mem>> -> memref<1x!tpu.dma_semaphore, #tpu.memory_space<semaphore_mem>>
    %112 = tpu.memref_squeeze %111 : memref<1x!tpu.dma_semaphore, #tpu.memory_space<semaphore_mem>> -> memref<!tpu.dma_semaphore, #tpu.memory_space<semaphore_mem>>
    tpu.enqueue_dma source(%109 : memref<1x32xf32, #tpu.memory_space<any>>) target(%110 : memref<1x32xf32, #tpu.memory_space<vmem>>) target_semaphore(%112 : memref<!tpu.dma_semaphore, #tpu.memory_space<semaphore_mem>>)
    %c0_i32_64 = arith.constant 0 : i32
    %c0_i32_65 = arith.constant 0 : i32
    %113 = tpu.memref_slice %arg2[%3, %c0_i32_65] : memref<64x32xf32, #tpu.memory_space<any>> -> memref<1x32xf32, #tpu.memory_space<any>>
    %c0_i32_66 = arith.constant 0 : i32
    %c0_i32_67 = arith.constant 0 : i32
    %114 = tpu.memref_slice %arg3[%c0_i32_66, %c0_i32_67] : memref<16x32xf32, #tpu.memory_space<vmem>> -> memref<1x32xf32, #tpu.memory_space<vmem>>
    %115 = tpu.memref_slice %arg4[%c0_i32_64] : memref<16x!tpu.dma_semaphore, #tpu.memory_space<semaphore_mem>> -> memref<1x!tpu.dma_semaphore, #tpu.memory_space<semaphore_mem>>
    %116 = tpu.memref_squeeze %115 : memref<1x!tpu.dma_semaphore, #tpu.memory_space<semaphore_mem>> -> memref<!tpu.dma_semaphore, #tpu.memory_space<semaphore_mem>>
    tpu.wait_dma2 semaphore(%116 : memref<!tpu.dma_semaphore, #tpu.memory_space<semaphore_mem>>) src(%113 : memref<1x32xf32, #tpu.memory_space<any>>) dst(%114 : memref<1x32xf32, #tpu.memory_space<vmem>>)
    %c1_i32_68 = arith.constant 1 : i32
    %c0_i32_69 = arith.constant 0 : i32
    %117 = tpu.memref_slice %arg2[%10, %c0_i32_69] : memref<64x32xf32, #tpu.memory_space<any>> -> memref<1x32xf32, #tpu.memory_space<any>>
    %c1_i32_70 = arith.constant 1 : i32
    %c0_i32_71 = arith.constant 0 : i32
    %118 = tpu.memref_slice %arg3[%c1_i32_70, %c0_i32_71] : memref<16x32xf32, #tpu.memory_space<vmem>> -> memref<1x32xf32, #tpu.memory_space<vmem>>
    %119 = tpu.memref_slice %arg4[%c1_i32_68] : memref<16x!tpu.dma_semaphore, #tpu.memory_space<semaphore_mem>> -> memref<1x!tpu.dma_semaphore, #tpu.memory_space<semaphore_mem>>
    %120 = tpu.memref_squeeze %119 : memref<1x!tpu.dma_semaphore, #tpu.memory_space<semaphore_mem>> -> memref<!tpu.dma_semaphore, #tpu.memory_space<semaphore_mem>>
    tpu.wait_dma2 semaphore(%120 : memref<!tpu.dma_semaphore, #tpu.memory_space<semaphore_mem>>) src(%117 : memref<1x32xf32, #tpu.memory_space<any>>) dst(%118 : memref<1x32xf32, #tpu.memory_space<vmem>>)
    %c2_i32_72 = arith.constant 2 : i32
    %c0_i32_73 = arith.constant 0 : i32
    %121 = tpu.memref_slice %arg2[%17, %c0_i32_73] : memref<64x32xf32, #tpu.memory_space<any>> -> memref<1x32xf32, #tpu.memory_space<any>>
    %c2_i32_74 = arith.constant 2 : i32
    %c0_i32_75 = arith.constant 0 : i32
    %122 = tpu.memref_slice %arg3[%c2_i32_74, %c0_i32_75] : memref<16x32xf32, #tpu.memory_space<vmem>> -> memref<1x32xf32, #tpu.memory_space<vmem>>
    %123 = tpu.memref_slice %arg4[%c2_i32_72] : memref<16x!tpu.dma_semaphore, #tpu.memory_space<semaphore_mem>> -> memref<1x!tpu.dma_semaphore, #tpu.memory_space<semaphore_mem>>
    %124 = tpu.memref_squeeze %123 : memref<1x!tpu.dma_semaphore, #tpu.memory_space<semaphore_mem>> -> memref<!tpu.dma_semaphore, #tpu.memory_space<semaphore_mem>>
    tpu.wait_dma2 semaphore(%124 : memref<!tpu.dma_semaphore, #tpu.memory_space<semaphore_mem>>) src(%121 : memref<1x32xf32, #tpu.memory_space<any>>) dst(%122 : memref<1x32xf32, #tpu.memory_space<vmem>>)
    %c3_i32_76 = arith.constant 3 : i32
    %c0_i32_77 = arith.constant 0 : i32
    %125 = tpu.memref_slice %arg2[%24, %c0_i32_77] : memref<64x32xf32, #tpu.memory_space<any>> -> memref<1x32xf32, #tpu.memory_space<any>>
    %c3_i32_78 = arith.constant 3 : i32
    %c0_i32_79 = arith.constant 0 : i32
    %126 = tpu.memref_slice %arg3[%c3_i32_78, %c0_i32_79] : memref<16x32xf32, #tpu.memory_space<vmem>> -> memref<1x32xf32, #tpu.memory_space<vmem>>
    %127 = tpu.memref_slice %arg4[%c3_i32_76] : memref<16x!tpu.dma_semaphore, #tpu.memory_space<semaphore_mem>> -> memref<1x!tpu.dma_semaphore, #tpu.memory_space<semaphore_mem>>
    %128 = tpu.memref_squeeze %127 : memref<1x!tpu.dma_semaphore, #tpu.memory_space<semaphore_mem>> -> memref<!tpu.dma_semaphore, #tpu.memory_space<semaphore_mem>>
    tpu.wait_dma2 semaphore(%128 : memref<!tpu.dma_semaphore, #tpu.memory_space<semaphore_mem>>) src(%125 : memref<1x32xf32, #tpu.memory_space<any>>) dst(%126 : memref<1x32xf32, #tpu.memory_space<vmem>>)
    %c4_i32_80 = arith.constant 4 : i32
    %c0_i32_81 = arith.constant 0 : i32
    %129 = tpu.memref_slice %arg2[%31, %c0_i32_81] : memref<64x32xf32, #tpu.memory_space<any>> -> memref<1x32xf32, #tpu.memory_space<any>>
    %c4_i32_82 = arith.constant 4 : i32
    %c0_i32_83 = arith.constant 0 : i32
    %130 = tpu.memref_slice %arg3[%c4_i32_82, %c0_i32_83] : memref<16x32xf32, #tpu.memory_space<vmem>> -> memref<1x32xf32, #tpu.memory_space<vmem>>
    %131 = tpu.memref_slice %arg4[%c4_i32_80] : memref<16x!tpu.dma_semaphore, #tpu.memory_space<semaphore_mem>> -> memref<1x!tpu.dma_semaphore, #tpu.memory_space<semaphore_mem>>
    %132 = tpu.memref_squeeze %131 : memref<1x!tpu.dma_semaphore, #tpu.memory_space<semaphore_mem>> -> memref<!tpu.dma_semaphore, #tpu.memory_space<semaphore_mem>>
    tpu.wait_dma2 semaphore(%132 : memref<!tpu.dma_semaphore, #tpu.memory_space<semaphore_mem>>) src(%129 : memref<1x32xf32, #tpu.memory_space<any>>) dst(%130 : memref<1x32xf32, #tpu.memory_space<vmem>>)
    %c5_i32_84 = arith.constant 5 : i32
    %c0_i32_85 = arith.constant 0 : i32
    %133 = tpu.memref_slice %arg2[%38, %c0_i32_85] : memref<64x32xf32, #tpu.memory_space<any>> -> memref<1x32xf32, #tpu.memory_space<any>>
    %c5_i32_86 = arith.constant 5 : i32
    %c0_i32_87 = arith.constant 0 : i32
    %134 = tpu.memref_slice %arg3[%c5_i32_86, %c0_i32_87] : memref<16x32xf32, #tpu.memory_space<vmem>> -> memref<1x32xf32, #tpu.memory_space<vmem>>
    %135 = tpu.memref_slice %arg4[%c5_i32_84] : memref<16x!tpu.dma_semaphore, #tpu.memory_space<semaphore_mem>> -> memref<1x!tpu.dma_semaphore, #tpu.memory_space<semaphore_mem>>
    %136 = tpu.memref_squeeze %135 : memref<1x!tpu.dma_semaphore, #tpu.memory_space<semaphore_mem>> -> memref<!tpu.dma_semaphore, #tpu.memory_space<semaphore_mem>>
    tpu.wait_dma2 semaphore(%136 : memref<!tpu.dma_semaphore, #tpu.memory_space<semaphore_mem>>) src(%133 : memref<1x32xf32, #tpu.memory_space<any>>) dst(%134 : memref<1x32xf32, #tpu.memory_space<vmem>>)
    %c6_i32_88 = arith.constant 6 : i32
    %c0_i32_89 = arith.constant 0 : i32
    %137 = tpu.memref_slice %arg2[%45, %c0_i32_89] : memref<64x32xf32, #tpu.memory_space<any>> -> memref<1x32xf32, #tpu.memory_space<any>>
    %c6_i32_90 = arith.constant 6 : i32
    %c0_i32_91 = arith.constant 0 : i32
    %138 = tpu.memref_slice %arg3[%c6_i32_90, %c0_i32_91] : memref<16x32xf32, #tpu.memory_space<vmem>> -> memref<1x32xf32, #tpu.memory_space<vmem>>
    %139 = tpu.memref_slice %arg4[%c6_i32_88] : memref<16x!tpu.dma_semaphore, #tpu.memory_space<semaphore_mem>> -> memref<1x!tpu.dma_semaphore, #tpu.memory_space<semaphore_mem>>
    %140 = tpu.memref_squeeze %139 : memref<1x!tpu.dma_semaphore, #tpu.memory_space<semaphore_mem>> -> memref<!tpu.dma_semaphore, #tpu.memory_space<semaphore_mem>>
    tpu.wait_dma2 semaphore(%140 : memref<!tpu.dma_semaphore, #tpu.memory_space<semaphore_mem>>) src(%137 : memref<1x32xf32, #tpu.memory_space<any>>) dst(%138 : memref<1x32xf32, #tpu.memory_space<vmem>>)
    %c7_i32_92 = arith.constant 7 : i32
    %c0_i32_93 = arith.constant 0 : i32
    %141 = tpu.memref_slice %arg2[%52, %c0_i32_93] : memref<64x32xf32, #tpu.memory_space<any>> -> memref<1x32xf32, #tpu.memory_space<any>>
    %c7_i32_94 = arith.constant 7 : i32
    %c0_i32_95 = arith.constant 0 : i32
    %142 = tpu.memref_slice %arg3[%c7_i32_94, %c0_i32_95] : memref<16x32xf32, #tpu.memory_space<vmem>> -> memref<1x32xf32, #tpu.memory_space<vmem>>
    %143 = tpu.memref_slice %arg4[%c7_i32_92] : memref<16x!tpu.dma_semaphore, #tpu.memory_space<semaphore_mem>> -> memref<1x!tpu.dma_semaphore, #tpu.memory_space<semaphore_mem>>
    %144 = tpu.memref_squeeze %143 : memref<1x!tpu.dma_semaphore, #tpu.memory_space<semaphore_mem>> -> memref<!tpu.dma_semaphore, #tpu.memory_space<semaphore_mem>>
    tpu.wait_dma2 semaphore(%144 : memref<!tpu.dma_semaphore, #tpu.memory_space<semaphore_mem>>) src(%141 : memref<1x32xf32, #tpu.memory_space<any>>) dst(%142 : memref<1x32xf32, #tpu.memory_space<vmem>>)
    %c8_i32_96 = arith.constant 8 : i32
    %c0_i32_97 = arith.constant 0 : i32
    %145 = tpu.memref_slice %arg2[%59, %c0_i32_97] : memref<64x32xf32, #tpu.memory_space<any>> -> memref<1x32xf32, #tpu.memory_space<any>>
    %c8_i32_98 = arith.constant 8 : i32
    %c0_i32_99 = arith.constant 0 : i32
    %146 = tpu.memref_slice %arg3[%c8_i32_98, %c0_i32_99] : memref<16x32xf32, #tpu.memory_space<vmem>> -> memref<1x32xf32, #tpu.memory_space<vmem>>
    %147 = tpu.memref_slice %arg4[%c8_i32_96] : memref<16x!tpu.dma_semaphore, #tpu.memory_space<semaphore_mem>> -> memref<1x!tpu.dma_semaphore, #tpu.memory_space<semaphore_mem>>
    %148 = tpu.memref_squeeze %147 : memref<1x!tpu.dma_semaphore, #tpu.memory_space<semaphore_mem>> -> memref<!tpu.dma_semaphore, #tpu.memory_space<semaphore_mem>>
    tpu.wait_dma2 semaphore(%148 : memref<!tpu.dma_semaphore, #tpu.memory_space<semaphore_mem>>) src(%145 : memref<1x32xf32, #tpu.memory_space<any>>) dst(%146 : memref<1x32xf32, #tpu.memory_space<vmem>>)
    %c9_i32_100 = arith.constant 9 : i32
    %c0_i32_101 = arith.constant 0 : i32
    %149 = tpu.memref_slice %arg2[%66, %c0_i32_101] : memref<64x32xf32, #tpu.memory_space<any>> -> memref<1x32xf32, #tpu.memory_space<any>>
    %c9_i32_102 = arith.constant 9 : i32
    %c0_i32_103 = arith.constant 0 : i32
    %150 = tpu.memref_slice %arg3[%c9_i32_102, %c0_i32_103] : memref<16x32xf32, #tpu.memory_space<vmem>> -> memref<1x32xf32, #tpu.memory_space<vmem>>
    %151 = tpu.memref_slice %arg4[%c9_i32_100] : memref<16x!tpu.dma_semaphore, #tpu.memory_space<semaphore_mem>> -> memref<1x!tpu.dma_semaphore, #tpu.memory_space<semaphore_mem>>
    %152 = tpu.memref_squeeze %151 : memref<1x!tpu.dma_semaphore, #tpu.memory_space<semaphore_mem>> -> memref<!tpu.dma_semaphore, #tpu.memory_space<semaphore_mem>>
    tpu.wait_dma2 semaphore(%152 : memref<!tpu.dma_semaphore, #tpu.memory_space<semaphore_mem>>) src(%149 : memref<1x32xf32, #tpu.memory_space<any>>) dst(%150 : memref<1x32xf32, #tpu.memory_space<vmem>>)
    %c10_i32_104 = arith.constant 10 : i32
    %c0_i32_105 = arith.constant 0 : i32
    %153 = tpu.memref_slice %arg2[%73, %c0_i32_105] : memref<64x32xf32, #tpu.memory_space<any>> -> memref<1x32xf32, #tpu.memory_space<any>>
    %c10_i32_106 = arith.constant 10 : i32
    %c0_i32_107 = arith.constant 0 : i32
    %154 = tpu.memref_slice %arg3[%c10_i32_106, %c0_i32_107] : memref<16x32xf32, #tpu.memory_space<vmem>> -> memref<1x32xf32, #tpu.memory_space<vmem>>
    %155 = tpu.memref_slice %arg4[%c10_i32_104] : memref<16x!tpu.dma_semaphore, #tpu.memory_space<semaphore_mem>> -> memref<1x!tpu.dma_semaphore, #tpu.memory_space<semaphore_mem>>
    %156 = tpu.memref_squeeze %155 : memref<1x!tpu.dma_semaphore, #tpu.memory_space<semaphore_mem>> -> memref<!tpu.dma_semaphore, #tpu.memory_space<semaphore_mem>>
    tpu.wait_dma2 semaphore(%156 : memref<!tpu.dma_semaphore, #tpu.memory_space<semaphore_mem>>) src(%153 : memref<1x32xf32, #tpu.memory_space<any>>) dst(%154 : memref<1x32xf32, #tpu.memory_space<vmem>>)
    %c11_i32_108 = arith.constant 11 : i32
    %c0_i32_109 = arith.constant 0 : i32
    %157 = tpu.memref_slice %arg2[%80, %c0_i32_109] : memref<64x32xf32, #tpu.memory_space<any>> -> memref<1x32xf32, #tpu.memory_space<any>>
    %c11_i32_110 = arith.constant 11 : i32
    %c0_i32_111 = arith.constant 0 : i32
    %158 = tpu.memref_slice %arg3[%c11_i32_110, %c0_i32_111] : memref<16x32xf32, #tpu.memory_space<vmem>> -> memref<1x32xf32, #tpu.memory_space<vmem>>
    %159 = tpu.memref_slice %arg4[%c11_i32_108] : memref<16x!tpu.dma_semaphore, #tpu.memory_space<semaphore_mem>> -> memref<1x!tpu.dma_semaphore, #tpu.memory_space<semaphore_mem>>
    %160 = tpu.memref_squeeze %159 : memref<1x!tpu.dma_semaphore, #tpu.memory_space<semaphore_mem>> -> memref<!tpu.dma_semaphore, #tpu.memory_space<semaphore_mem>>
    tpu.wait_dma2 semaphore(%160 : memref<!tpu.dma_semaphore, #tpu.memory_space<semaphore_mem>>) src(%157 : memref<1x32xf32, #tpu.memory_space<any>>) dst(%158 : memref<1x32xf32, #tpu.memory_space<vmem>>)
    %c12_i32_112 = arith.constant 12 : i32
    %c0_i32_113 = arith.constant 0 : i32
    %161 = tpu.memref_slice %arg2[%87, %c0_i32_113] : memref<64x32xf32, #tpu.memory_space<any>> -> memref<1x32xf32, #tpu.memory_space<any>>
    %c12_i32_114 = arith.constant 12 : i32
    %c0_i32_115 = arith.constant 0 : i32
    %162 = tpu.memref_slice %arg3[%c12_i32_114, %c0_i32_115] : memref<16x32xf32, #tpu.memory_space<vmem>> -> memref<1x32xf32, #tpu.memory_space<vmem>>
    %163 = tpu.memref_slice %arg4[%c12_i32_112] : memref<16x!tpu.dma_semaphore, #tpu.memory_space<semaphore_mem>> -> memref<1x!tpu.dma_semaphore, #tpu.memory_space<semaphore_mem>>
    %164 = tpu.memref_squeeze %163 : memref<1x!tpu.dma_semaphore, #tpu.memory_space<semaphore_mem>> -> memref<!tpu.dma_semaphore, #tpu.memory_space<semaphore_mem>>
    tpu.wait_dma2 semaphore(%164 : memref<!tpu.dma_semaphore, #tpu.memory_space<semaphore_mem>>) src(%161 : memref<1x32xf32, #tpu.memory_space<any>>) dst(%162 : memref<1x32xf32, #tpu.memory_space<vmem>>)
    %c13_i32_116 = arith.constant 13 : i32
    %c0_i32_117 = arith.constant 0 : i32
    %165 = tpu.memref_slice %arg2[%94, %c0_i32_117] : memref<64x32xf32, #tpu.memory_space<any>> -> memref<1x32xf32, #tpu.memory_space<any>>
    %c13_i32_118 = arith.constant 13 : i32
    %c0_i32_119 = arith.constant 0 : i32
    %166 = tpu.memref_slice %arg3[%c13_i32_118, %c0_i32_119] : memref<16x32xf32, #tpu.memory_space<vmem>> -> memref<1x32xf32, #tpu.memory_space<vmem>>
    %167 = tpu.memref_slice %arg4[%c13_i32_116] : memref<16x!tpu.dma_semaphore, #tpu.memory_space<semaphore_mem>> -> memref<1x!tpu.dma_semaphore, #tpu.memory_space<semaphore_mem>>
    %168 = tpu.memref_squeeze %167 : memref<1x!tpu.dma_semaphore, #tpu.memory_space<semaphore_mem>> -> memref<!tpu.dma_semaphore, #tpu.memory_space<semaphore_mem>>
    tpu.wait_dma2 semaphore(%168 : memref<!tpu.dma_semaphore, #tpu.memory_space<semaphore_mem>>) src(%165 : memref<1x32xf32, #tpu.memory_space<any>>) dst(%166 : memref<1x32xf32, #tpu.memory_space<vmem>>)
    %c14_i32_120 = arith.constant 14 : i32
    %c0_i32_121 = arith.constant 0 : i32
    %169 = tpu.memref_slice %arg2[%101, %c0_i32_121] : memref<64x32xf32, #tpu.memory_space<any>> -> memref<1x32xf32, #tpu.memory_space<any>>
    %c14_i32_122 = arith.constant 14 : i32
    %c0_i32_123 = arith.constant 0 : i32
    %170 = tpu.memref_slice %arg3[%c14_i32_122, %c0_i32_123] : memref<16x32xf32, #tpu.memory_space<vmem>> -> memref<1x32xf32, #tpu.memory_space<vmem>>
    %171 = tpu.memref_slice %arg4[%c14_i32_120] : memref<16x!tpu.dma_semaphore, #tpu.memory_space<semaphore_mem>> -> memref<1x!tpu.dma_semaphore, #tpu.memory_space<semaphore_mem>>
    %172 = tpu.memref_squeeze %171 : memref<1x!tpu.dma_semaphore, #tpu.memory_space<semaphore_mem>> -> memref<!tpu.dma_semaphore, #tpu.memory_space<semaphore_mem>>
    tpu.wait_dma2 semaphore(%172 : memref<!tpu.dma_semaphore, #tpu.memory_space<semaphore_mem>>) src(%169 : memref<1x32xf32, #tpu.memory_space<any>>) dst(%170 : memref<1x32xf32, #tpu.memory_space<vmem>>)
    %c15_i32_124 = arith.constant 15 : i32
    %c0_i32_125 = arith.constant 0 : i32
    %173 = tpu.memref_slice %arg2[%108, %c0_i32_125] : memref<64x32xf32, #tpu.memory_space<any>> -> memref<1x32xf32, #tpu.memory_space<any>>
    %c15_i32_126 = arith.constant 15 : i32
    %c0_i32_127 = arith.constant 0 : i32
    %174 = tpu.memref_slice %arg3[%c15_i32_126, %c0_i32_127] : memref<16x32xf32, #tpu.memory_space<vmem>> -> memref<1x32xf32, #tpu.memory_space<vmem>>
    %175 = tpu.memref_slice %arg4[%c15_i32_124] : memref<16x!tpu.dma_semaphore, #tpu.memory_space<semaphore_mem>> -> memref<1x!tpu.dma_semaphore, #tpu.memory_space<semaphore_mem>>
    %176 = tpu.memref_squeeze %175 : memref<1x!tpu.dma_semaphore, #tpu.memory_space<semaphore_mem>> -> memref<!tpu.dma_semaphore, #tpu.memory_space<semaphore_mem>>
    tpu.wait_dma2 semaphore(%176 : memref<!tpu.dma_semaphore, #tpu.memory_space<semaphore_mem>>) src(%173 : memref<1x32xf32, #tpu.memory_space<any>>) dst(%174 : memref<1x32xf32, #tpu.memory_space<vmem>>)
    return
  }
  func.func @transform_1(%arg0: i32, %arg1: memref<16xi32, #tpu.memory_space<smem>>) -> (i32, i32) {
    %c0_i32 = arith.constant 0 : i32
    %c0_i32_0 = arith.constant 0 : i32
    return %arg0, %c0_i32 : i32, i32
  }
}

</mosaic_0001>

<bundles_post_ra>
// kernel: tpu_custom_call.1
= control target key start
LH: loop header
LB: loop body
LE: loop exit
PB: predicated region body
PF: predicated region fallthrough
CT: control target
= control target key end

     0   :  { %s1355_s0 = inlined_call_operand.vmem [shape: s32[16], index: 0, kind: input, shape index: {}]   ;;  %s1356_s1 = inlined_call_operand.vmem [shape: f32[64,32], index: 1, kind: input, shape index: {}]   ;;  %s1357_s2 = inlined_call_operand.hbm [shape: f32[16,32], index: 2, kind: output, shape index: {}]  }
   0x1   :  { %s7_s11 = sshll.u32 %s1355_s0, 4  ;;  %s8_s11 = int_to_ptr.vmem [resolvable:$true] %s7_s11 }
   0x2   :  { %s1214_s12 = scalar_lea.vmem %s8_s11, 16  ;;  %p1219_p1 = scmp.lt.s32.totalorder %s8_s11, %s8_s11 }
   0x3   :  { %p1215_p0 = scmp.ne.s32.totalorder %s8_s11, %s1214_s12  ;;  %p1220_p2 = scmp.lt.s32.totalorder %s1214_s12, %s1214_s12 }
   0x5   :  { %p1221_p3 = por %p1220_p2, %p1219_p1 }
   0x7   :  { %p1222_p4 = pnand %p1221_p3, %p1215_p0 }
   0x9   :  { %1225 = shalt.err (!%p1222_p4)  }
   0xa   :  { %s1282_s13 = smov [#allocation4]  }
   0xb   :  { %10 = dma.vmem_to_smem %s8_s11, 16, %s1282_s13, [#allocation3] }
   0xc   :  { %1246 = dma.done.wait [#allocation3], 16 }
   0xd   :  { %1247 = vsyncadd [#allocation3], 4294967280 }
   0xe   :  { %12 = sfence }
   0xf   :  { %13 = vsyncpa [#allocation6], 0  ;;  %s15_s14 = sld [smem:[#allocation4]] }
  0x15   :  { %s16_s17 = scalar_lea.vmem %s1356_s1, %s15_s14 }
  0x16   :  { %v35_v0 = vld [vmem:[%s16_s17] sm:$0x1] }
  0x17   :  { %36 = vst [vmem:[#allocation5] sm:$0x1] %v35_v0 }
  0x18   :  { %62 = vsyncadd [#allocation2], 16  ;;  %s1179_s0 = sld [smem:[#allocation4 + $0x1]] }
  0x1e   :  { %s65_s20 = scalar_lea.vmem %s1356_s1, %s1179_s0 }
  0x1f   :  { %v86_v1 = vld [vmem:[%s65_s20] sm:$0x1] }
  0x20   :  { %87 = vst [vmem:[#allocation5 + $0x1] sm:$0x1] %v86_v1 }
  0x21   :  { %113 = vsyncadd [#allocation2 + $0x1], 16  ;;  %s1180_s21 = sld [smem:[#allocation4 + $0x2]] }
  0x27   :  { %s116_s24 = scalar_lea.vmem %s1356_s1, %s1180_s21 }
  0x28   :  { %v137_v2 = vld [vmem:[%s116_s24] sm:$0x1] }
  0x29   :  { %138 = vst [vmem:[#allocation5 + $0x2] sm:$0x1] %v137_v2 }
  0x2a   :  { %164 = vsyncadd [#allocation2 + $0x2], 16  ;;  %s1181_s25 = sld [smem:[#allocation4 + $0x3]] }
  0x30   :  { %s167_s28 = scalar_lea.vmem %s1356_s1, %s1181_s25 }
  0x31   :  { %v188_v3 = vld [vmem:[%s167_s28] sm:$0x1] }
  0x32   :  { %189 = vst [vmem:[#allocation5 + $0x3] sm:$0x1] %v188_v3 }
  0x33   :  { %215 = vsyncadd [#allocation2 + $0x3], 16  ;;  %s1182_s29 = sld [smem:[#allocation4 + $0x4]] }
  0x39   :  { %s218_s4 = scalar_lea.vmem %s1356_s1, %s1182_s29 }
  0x3a   :  { %v239_v4 = vld [vmem:[%s218_s4] sm:$0x1] }
  0x3b   :  { %240 = vst [vmem:[#allocation5 + $0x4] sm:$0x1] %v239_v4 }
  0x3c   :  { %266 = vsyncadd [#allocation2 + $0x4], 16  ;;  %s1183_s5 = sld [smem:[#allocation4 + $0x5]] }
  0x42   :  { %s269_s8 = scalar_lea.vmem %s1356_s1, %s1183_s5 }
  0x43   :  { %v290_v5 = vld [vmem:[%s269_s8] sm:$0x1] }
  0x44   :  { %291 = vst [vmem:[#allocation5 + $0x5] sm:$0x1] %v290_v5 }
  0x45   :  { %317 = vsyncadd [#allocation2 + $0x5], 16  ;;  %s1184_s9 = sld [smem:[#allocation4 + $0x6]] }
  0x4b   :  { %s320_s12 = scalar_lea.vmem %s1356_s1, %s1184_s9 }
  0x4c   :  { %v341_v6 = vld [vmem:[%s320_s12] sm:$0x1] }
  0x4d   :  { %342 = vst [vmem:[#allocation5 + $0x6] sm:$0x1] %v341_v6 }
  0x4e   :  { %368 = vsyncadd [#allocation2 + $0x6], 16  ;;  %s1185_s13 = sld [smem:[#allocation4 + $0x7]] }
  0x54   :  { %s371_s16 = scalar_lea.vmem %s1356_s1, %s1185_s13 }
  0x55   :  { %v392_v7 = vld [vmem:[%s371_s16] sm:$0x1] }
  0x56   :  { %393 = vst [vmem:[#allocation5 + $0x7] sm:$0x1] %v392_v7 }
  0x57   :  { %419 = vsyncadd [#allocation2 + $0x7], 16  ;;  %s1186_s17 = sld [smem:[#allocation4 + $0x8]] }
  0x5d   :  { %s422_s19 = scalar_lea.vmem %s1356_s1, %s1186_s17 }
  0x5e   :  { %v443_v8 = vld [vmem:[%s422_s19] sm:$0x1] }
  0x5f   :  { %444 = vst [vmem:[#allocation5 + $0x8] sm:$0x1] %v443_v8 }
  0x60   :  { %470 = vsyncadd [#allocation2 + $0x8], 16  ;;  %s1187_s20 = sld [smem:[#allocation4 + $0x9]] }
  0x66   :  { %s473_s23 = scalar_lea.vmem %s1356_s1, %s1187_s20 }
  0x67   :  { %v494_v9 = vld [vmem:[%s473_s23] sm:$0x1] }
  0x68   :  { %495 = vst [vmem:[#allocation5 + $0x9] sm:$0x1] %v494_v9 }
  0x69   :  { %521 = vsyncadd [#allocation2 + $0x9], 16  ;;  %s1188_s24 = sld [smem:[#allocation4 + $0xa]] }
  0x6f   :  { %s524_s27 = scalar_lea.vmem %s1356_s1, %s1188_s24 }
  0x70   :  { %v545_v10 = vld [vmem:[%s524_s27] sm:$0x1] }
  0x71   :  { %546 = vst [vmem:[#allocation5 + $0xa] sm:$0x1] %v545_v10 }
  0x72   :  { %572 = vsyncadd [#allocation2 + $0xa], 16  ;;  %s1189_s28 = sld [smem:[#allocation4 + $0xb]] }
  0x78   :  { %s575_s3 = scalar_lea.vmem %s1356_s1, %s1189_s28 }
  0x79   :  { %v596_v11 = vld [vmem:[%s575_s3] sm:$0x1] }
  0x7a   :  { %597 = vst [vmem:[#allocation5 + $0xb] sm:$0x1] %v596_v11 }
  0x7b   :  { %623 = vsyncadd [#allocation2 + $0xb], 16  ;;  %s1190_s4 = sld [smem:[#allocation4 + $0xc]] }
  0x81   :  { %s626_s7 = scalar_lea.vmem %s1356_s1, %s1190_s4 }
  0x82   :  { %v647_v12 = vld [vmem:[%s626_s7] sm:$0x1] }
  0x83   :  { %648 = vst [vmem:[#allocation5 + $0xc] sm:$0x1] %v647_v12 }
  0x84   :  { %674 = vsyncadd [#allocation2 + $0xc], 16  ;;  %s1191_s8 = sld [smem:[#allocation4 + $0xd]] }
  0x8a   :  { %s677_s11 = scalar_lea.vmem %s1356_s1, %s1191_s8 }
  0x8b   :  { %v698_v13 = vld [vmem:[%s677_s11] sm:$0x1] }
  0x8c   :  { %699 = vst [vmem:[#allocation5 + $0xd] sm:$0x1] %v698_v13 }
  0x8d   :  { %725 = vsyncadd [#allocation2 + $0xd], 16  ;;  %s1192_s12 = sld [smem:[#allocation4 + $0xe]] }
  0x93   :  { %s728_s15 = scalar_lea.vmem %s1356_s1, %s1192_s12 }
  0x94   :  { %v749_v14 = vld [vmem:[%s728_s15] sm:$0x1] }
  0x95   :  { %750 = vst [vmem:[#allocation5 + $0xe] sm:$0x1] %v749_v14 }
  0x96   :  { %776 = vsyncadd [#allocation2 + $0xe], 16  ;;  %s1193_s16 = sld [smem:[#allocation4 + $0xf]] }
  0x9c   :  { %s779_s18 = scalar_lea.vmem %s1356_s1, %s1193_s16 }
  0x9d   :  { %v800_v15 = vld [vmem:[%s779_s18] sm:$0x1] }
  0x9e   :  { %801 = vst [vmem:[#allocation5 + $0xf] sm:$0x1] %v800_v15 }
  0x9f   :  { %827 = vsyncadd [#allocation2 + $0xf], 16 }
  0xa0   :  { %1248 = dma.done.wait [#allocation2], 16 }
  0xa1   :  { %1249 = vsyncadd [#allocation2], 4294967280 }
  0xa2   :  { %1250 = dma.done.wait [#allocation2 + $0x1], 16 }
  0xa3   :  { %1251 = vsyncadd [#allocation2 + $0x1], 4294967280 }
  0xa4   :  { %1252 = dma.done.wait [#allocation2 + $0x2], 16 }
  0xa5   :  { %1253 = vsyncadd [#allocation2 + $0x2], 4294967280 }
  0xa6   :  { %1254 = dma.done.wait [#allocation2 + $0x3], 16 }
  0xa7   :  { %1255 = vsyncadd [#allocation2 + $0x3], 4294967280 }
  0xa8   :  { %1256 = dma.done.wait [#allocation2 + $0x4], 16 }
  0xa9   :  { %1257 = vsyncadd [#allocation2 + $0x4], 4294967280 }
  0xaa   :  { %1258 = dma.done.wait [#allocation2 + $0x5], 16 }
  0xab   :  { %1259 = vsyncadd [#allocation2 + $0x5], 4294967280 }
  0xac   :  { %1260 = dma.done.wait [#allocation2 + $0x6], 16 }
  0xad   :  { %1261 = vsyncadd [#allocation2 + $0x6], 4294967280 }
  0xae   :  { %1262 = dma.done.wait [#allocation2 + $0x7], 16 }
  0xaf   :  { %1263 = vsyncadd [#allocation2 + $0x7], 4294967280 }
  0xb0   :  { %1264 = dma.done.wait [#allocation2 + $0x8], 16 }
  0xb1   :  { %1265 = vsyncadd [#allocation2 + $0x8], 4294967280 }
  0xb2   :  { %1266 = dma.done.wait [#allocation2 + $0x9], 16 }
  0xb3   :  { %1267 = vsyncadd [#allocation2 + $0x9], 4294967280 }
  0xb4   :  { %1268 = dma.done.wait [#allocation2 + $0xa], 16 }
  0xb5   :  { %1269 = vsyncadd [#allocation2 + $0xa], 4294967280 }
  0xb6   :  { %1270 = dma.done.wait [#allocation2 + $0xb], 16 }
  0xb7   :  { %1271 = vsyncadd [#allocation2 + $0xb], 4294967280 }
  0xb8   :  { %1272 = dma.done.wait [#allocation2 + $0xc], 16 }
  0xb9   :  { %1273 = vsyncadd [#allocation2 + $0xc], 4294967280 }
  0xba   :  { %1274 = dma.done.wait [#allocation2 + $0xd], 16 }
  0xbb   :  { %1275 = vsyncadd [#allocation2 + $0xd], 4294967280 }
  0xbc   :  { %1276 = dma.done.wait [#allocation2 + $0xe], 16 }
  0xbd   :  { %1277 = vsyncadd [#allocation2 + $0xe], 4294967280 }
  0xbe   :  { %1278 = dma.done.wait [#allocation2 + $0xf], 16 }
  0xbf   :  { %1279 = vsyncadd [#allocation2 + $0xf], 4294967280  ;;  %s1283_s1 = smov [#allocation5]  }
  0xc0   :  { %s866_s19 = sshll.u32 %s1283_s1, 4  ;;  %s867_s19 = int_to_ptr.vmem [resolvable:$true] %s866_s19 }
  0xc1   :  { %s1226_s20 = scalar_lea.vmem %s867_s19, 256  ;;  %p1231_p6 = scmp.lt.s32.totalorder %s867_s19, %s867_s19 }
  0xc2   :  { %p1227_p5 = scmp.ne.s32.totalorder %s867_s19, %s1226_s20  ;;  %p1232_p7 = scmp.lt.s32.totalorder %s1226_s20, %s1226_s20 }
  0xc4   :  { %p1233_p8 = por %p1232_p7, %p1231_p6 }
  0xc6   :  { %p1234_p9 = pnand %p1233_p8, %p1227_p5 }
  0xc8   :  { %1237 = shalt.err (!%p1234_p9)
}
  0xc9   :  { %s1284_s21 = smov 128   ;;  %s1285_s22 = smov 8  }
  0xca   :  { %872 = dma.vmem_to_hbm [thread:$0]  %s867_s19, 256, %s1357_s2, [#allocation6], %s1284_s21, %s1284_s21, %s1285_s22  }
  0xcb   :  { %1280 = dma.done.wait [#allocation6], 256  }
  0xcc   :  { %1281 = vsyncadd [#allocation6], 4294967040 }
  0xcd   :  { %876 = vsyncpa [#allocation6], 1 }
  0xce   :  { %877 = vsyncmov [#allocation2] }
  0xd1   :  { %s878_s25 = vpop.sfrf %877 }
  0xd2   :  { %p1194_p10 = scmp.ne.s32.totalorder %s878_s25, 0 }
  0xd4   :  { %882 = shalt.err (%p1194_p10)  }
  0xd5   :  { %884 = vsyncmov [#allocation2 + $0x1] }
  0xd8   :  { %s885_s26 = vpop.sfrf %884 }
  0xd9   :  { %p1195_p11 = scmp.ne.s32.totalorder %s885_s26, 0 }
  0xdb   :  { %889 = shalt.err (%p1195_p11)  }
  0xdc   :  { %891 = vsyncmov [#allocation2 + $0x2] }
  0xdf   :  { %s892_s27 = vpop.sfrf %891 }
  0xe0   :  { %p1196_p12 = scmp.ne.s32.totalorder %s892_s27, 0 }
  0xe2   :  { %896 = shalt.err (%p1196_p12)  }
  0xe3   :  { %898 = vsyncmov [#allocation2 + $0x3] }
  0xe6   :  { %s899_s28 = vpop.sfrf %898 }
  0xe7   :  { %p1197_p13 = scmp.ne.s32.totalorder %s899_s28, 0 }
  0xe9   :  { %903 = shalt.err (%p1197_p13)  }
  0xea   :  { %905 = vsyncmov [#allocation2 + $0x4] }
  0xed   :  { %s906_s2 = vpop.sfrf %905 }
  0xee   :  { %p1198_p0 = scmp.ne.s32.totalorder %s906_s2, 0 }
  0xf0   :  { %910 = shalt.err (%p1198_p0)  }
  0xf1   :  { %912 = vsyncmov [#allocation2 + $0x5] }
  0xf4   :  { %s913_s29 = vpop.sfrf %912 }
  0xf5   :  { %p1199_p1 = scmp.ne.s32.totalorder %s913_s29, 0 }
  0xf7   :  { %917 = shalt.err (%p1199_p1)  }
  0xf8   :  { %919 = vsyncmov [#allocation2 + $0x6] }
  0xfb   :  { %s920_s30 = vpop.sfrf %919 }
  0xfc   :  { %p1200_p2 = scmp.ne.s32.totalorder %s920_s30, 0 }
  0xfe   :  { %924 = shalt.err (%p1200_p2)  }
  0xff   :  { %926 = vsyncmov [#allocation2 + $0x7] }
 0x102   :  { %s927_s3 = vpop.sfrf %926 }
 0x103   :  { %p1201_p3 = scmp.ne.s32.totalorder %s927_s3, 0 }
 0x105   :  { %931 = shalt.err (%p1201_p3)  }
 0x106   :  { %933 = vsyncmov [#allocation2 + $0x8] }
 0x109   :  { %s934_s4 = vpop.sfrf %933 }
 0x10a   :  { %p1202_p4 = scmp.ne.s32.totalorder %s934_s4, 0 }
 0x10c   :  { %938 = shalt.err (%p1202_p4)  }
 0x10d   :  { %940 = vsyncmov [#allocation2 + $0x9] }
 0x110   :  { %s941_s5 = vpop.sfrf %940 }
 0x111   :  { %p1203_p5 = scmp.ne.s32.totalorder %s941_s5, 0 }
 0x113   :  { %945 = shalt.err (%p1203_p5)  }
 0x114   :  { %947 = vsyncmov [#allocation2 + $0xa] }
 0x117   :  { %s948_s6 = vpop.sfrf %947 }
 0x118   :  { %p1204_p6 = scmp.ne.s32.totalorder %s948_s6, 0 }
 0x11a   :  { %952 = shalt.err (%p1204_p6)  }
 0x11b   :  { %954 = vsyncmov [#allocation2 + $0xb] }
 0x11e   :  { %s955_s7 = vpop.sfrf %954 }
 0x11f   :  { %p1205_p7 = scmp.ne.s32.totalorder %s955_s7, 0 }
 0x121   :  { %959 = shalt.err (%p1205_p7)  }
 0x122   :  { %961 = vsyncmov [#allocation2 + $0xc] }
 0x125   :  { %s962_s8 = vpop.sfrf %961 }
 0x126   :  { %p1206_p8 = scmp.ne.s32.totalorder %s962_s8, 0 }
 0x128   :  { %966 = shalt.err (%p1206_p8)  }
 0x129   :  { %968 = vsyncmov [#allocation2 + $0xd] }
 0x12c   :  { %s969_s9 = vpop.sfrf %968 }
 0x12d   :  { %p1207_p9 = scmp.ne.s32.totalorder %s969_s9, 0 }
 0x12f   :  { %973 = shalt.err (%p1207_p9)  }
 0x130   :  { %975 = vsyncmov [#allocation2 + $0xe] }
 0x133   :  { %s976_s10 = vpop.sfrf %975 }
 0x134   :  { %p1208_p10 = scmp.ne.s32.totalorder %s976_s10, 0 }
 0x136   :  { %980 = shalt.err (%p1208_p10)  }
 0x137   :  { %982 = vsyncmov [#allocation2 + $0xf] }
 0x13a   :  { %s983_s11 = vpop.sfrf %982 }
 0x13b   :  { %p1209_p11 = scmp.ne.s32.totalorder %s983_s11, 0 }
 0x13d   :  { %987 = shalt.err (%p1209_p11)  }

</bundles_post_ra>
